<compile_context>
chip_gen: v7x
topology: tpu7x:2x2x1
jax: 0.10.0
libtpu: 0.0.40
codegen_flags: <defaults>
</compile_context>

<pallas_src>
import functools

import jax
import jax.numpy as jnp
from jax.experimental import pallas as pl
from jax.experimental.pallas import tpu as pltpu

# CheXpert-style task sequence (indices are static / known at trace time).
TASK_NAMES = [
    'No Finding', 'Enlarged Cardiomediastinum', 'Cardiomegaly',
    'Airspace Opacity', 'Lung Lesion', 'Edema', 'Consolidation', 'Pneumonia',
    'Atelectasis', 'Pneumothorax', 'Pleural Effusion', 'Pleural Other',
    'Fracture', 'Support Devices',
]
TASK_SEQUENCE = {name: i for i, name in enumerate(TASK_NAMES)}
NUM_TASKS = len(TASK_NAMES)

# Hierarchy edges: (parent, child) -> child gets parent's logit added.
HIERARCHY_EDGES = [
    ('Airspace Opacity', 'Edema'),
    ('Airspace Opacity', 'Atelectasis'),
    ('Airspace Opacity', 'Consolidation'),
    ('Airspace Opacity', 'Pneumonia'),
    ('Airspace Opacity', 'Lung Lesion'),
    ('Enlarged Cardiomediastinum', 'Cardiomegaly'),
]

# Tasks padded only to 16 (sublane dim of the transposed weights; one packed
# bf16 vreg group).  The output last dim stays 16 = full array extent (its
# traffic is negligible).
T_PAD = 16

# Largest K tile.  Double-buffered (16, tk) bf16 weights are ~1 MiB at
# tk=16384; the dominant VMEM user is the (tb, tk) activation double buffer
# (<= 16 MiB at tb=128, f32), safe on every generation incl. v7x (64 MiB).
MAX_TK = 16384
# Max batch tile (multiple of 8).
TB_MAX = 128


def _round_up(x, m):
    return ((x + m - 1) // m) * m


def _cdiv(a, b):
    return -(-a // b)


def _balanced_tiles(total, cap, align):
    """Split `total` into num tiles of size `tile` (multiple of `align`),
    tile <= cap, minimizing padding: returns (tile, num, padded_total)."""
    total_a = _round_up(max(total, 1), align)
    cap_a = min(_round_up(cap, align), total_a)
    num = _cdiv(total_a, cap_a)
    tile = _round_up(_cdiv(total_a, num), align)
    return tile, num, num * tile


def _hierarchy_matrix():
    """M = I + H over the real tasks; logits @ M == the sequential parent adds."""
    m = jnp.eye(NUM_TASKS, dtype=jnp.float32)
    for parent, child in HIERARCHY_EDGES:
        p, c = TASK_SEQUENCE[parent], TASK_SEQUENCE[child]
        m = m.at[p, c].add(1.0)
    return m


def _linear_hier_kernel(x_ref, w_ref, b_ref, out_ref, acc_ref):
    """K-tiled  out = x @ W'^T + b'  with f32 accumulation.

    x_ref : (tb, tk)      activations (f32 or bf16)
    w_ref : (T_PAD, tk)   folded, transposed bf16 weights (lane-dense)
    b_ref : (1, T_PAD)    folded bias (f32)
    """
    k = pl.program_id(1)

    @pl.when(k == 0)
    def _():
        # Bias folded into the accumulator init (epilogue is then a bare cast).
        acc_ref[...] = jnp.broadcast_to(b_ref[...], acc_ref.shape)

    # bf16 x bf16 -> f32 on the MXU, contracting the K (last) dims of both.
    acc_ref[...] += jax.lax.dot_general(
        x_ref[...].astype(jnp.bfloat16), w_ref[...],
        dimension_numbers=(((1,), (1,)), ((), ())),
        preferred_element_type=jnp.float32)

    @pl.when(k == pl.num_programs(1) - 1)
    def _():
        out_ref[...] = acc_ref[...].astype(out_ref.dtype)


@functools.partial(jax.jit, static_argnames=('tk', 'tb'))
def _run_kernel(x_pad, w_t, b_p, *, tk, tb):
    b_pad, d_pad = x_pad.shape
    t_pad = w_t.shape[0]
    num_b = b_pad // tb
    num_k = d_pad // tk

    # Double-buffered VMEM footprint (weights are lane-dense bf16; activation
    # buffer dominates).  Output/acc are lane-padded 16 -> 128 but tiny.
    act_buf = 2 * tb * tk * x_pad.dtype.itemsize
    w_buf = 2 * t_pad * tk * w_t.dtype.itemsize
    out_buf = 2 * tb * 128 * 4
    acc_buf = tb * 128 * 4
    bias_buf = 2 * 8 * 128 * 4
    vmem_limit = act_buf + w_buf + out_buf + acc_buf + bias_buf + (8 << 20)
    vmem_limit = int(max(16 << 20, min(vmem_limit, 48 << 20)))

    return pl.pallas_call(
        _linear_hier_kernel,
        out_shape=jax.ShapeDtypeStruct((b_pad, t_pad), jnp.float32),
        grid=(num_b, num_k),
        in_specs=[
            pl.BlockSpec((tb, tk), lambda b, k: (b, k)),     # activations
            pl.BlockSpec((t_pad, tk), lambda b, k: (0, k)),  # bf16 W'^T, lane-dense
            pl.BlockSpec((1, t_pad), lambda b, k: (0, 0)),   # bias, VMEM-resident
        ],
        out_specs=pl.BlockSpec((tb, t_pad), lambda b, k: (b, 0)),
        scratch_shapes=[pltpu.VMEM((tb, t_pad), jnp.float32)],
        compiler_params=pltpu.CompilerParams(
            # Batch axis parallel (megacore / v7x second TC), K axis is the
            # reduction (output block revisited) -> arbitrary, last.
            dimension_semantics=("parallel", "arbitrary"),
            vmem_limit_bytes=vmem_limit,
        ),
    )(x_pad, w_t, b_p)


@functools.partial(jax.jit, static_argnames=('d', 'd_pad', 'tk'))
def _forward(x_nchw, w_t, b_p, *, d, d_pad, tk):
    bsz = x_nchw.shape[0]
    tb, _, b_pad = _balanced_tiles(bsz, TB_MAX, 8)

    x_flat = x_nchw.reshape(bsz, -1)
    if (b_pad != bsz) or (d_pad != d):
        # The padding copy exists anyway -> fuse the bf16 cast into it,
        # halving activation HBM traffic read by the kernel.
        xp = jnp.zeros((b_pad, d_pad), jnp.bfloat16)
        x_flat = xp.at[:bsz, :d].set(x_flat.astype(jnp.bfloat16))
    # else: pass f32 straight through; the kernel casts in-register (adding a
    # standalone XLA cast here would only add un-hidden HBM traffic).

    out = _run_kernel(x_flat, w_t, b_p, tk=tk, tb=tb)
    return out[:bsz, :NUM_TASKS]


class HierarchyWrapperPallas:
    """Synthetic linear model + hierarchy adjustment, fused in one Pallas kernel.

    W' = W @ (I+H) and b' = b @ (I+H) are folded offline in __init__,
    transposed, padded once (K -> multiple of tk, tasks -> 16) and stored as
    lane-dense bf16, so __call__ does no parameter re-packing and the kernel
    is a single batch/K-tiled matmul with the bias folded into the accumulator.
    """

    def __init__(self, in_channels, height, width, key, *, max_tk=MAX_TK):
        self.d = in_channels * height * width
        # Balanced K tiling: short grid AND minimal padding waste (< 128 cols).
        self.tk, self.num_k, self.d_pad = _balanced_tiles(self.d, max_tk, 128)

        kw, kb = jax.random.split(key)
        # Deterministic synthetic "model" parameters (f32 copies kept for the
        # reference check in __main__).
        self.w_base = (jax.random.normal(kw, (self.d, NUM_TASKS), jnp.float32)
                       / jnp.sqrt(jnp.float32(self.d)))
        self.b_base = 0.01 * jax.random.normal(kb, (NUM_TASKS,), jnp.float32)

        # The one-shot fold W@(I+H) is only equivalent to the sequential
        # in-place adds because no parent index is also a child index.
        parents = {TASK_SEQUENCE[p] for p, _ in HIERARCHY_EDGES}
        children = {TASK_SEQUENCE[c] for _, c in HIERARCHY_EDGES}
        assert not (parents & children), "chained hierarchy edges break the fold"

        m = _hierarchy_matrix()
        w_fold = self.w_base @ m          # (D, T)
        b_fold = self.b_base @ m          # (T,)

        # One-time transpose + pad + bf16 cast, hoisted out of the forward.
        w_t = jnp.zeros((T_PAD, self.d_pad), jnp.float32)
        w_t = w_t.at[:NUM_TASKS, :self.d].set(w_fold.T)
        self.w_t = w_t.astype(jnp.bfloat16)           # (T_PAD, d_pad) lane-dense
        self.b_p = (jnp.zeros((1, T_PAD), jnp.float32)
                    .at[0, :NUM_TASKS].set(b_fold))

    def __call__(self, x_nchw):
        return _forward(x_nchw, self.w_t, self.b_p,
                        d=self.d, d_pad=self.d_pad, tk=self.tk)


def _reference_semantic(x_nchw, w, b):
    """Pure-JAX f32 reference reproducing the PyTorch forward exactly."""
    ls = TASK_SEQUENCE
    logits = x_nchw.reshape(x_nchw.shape[0], -1).astype(jnp.float32) @ w + b
    for parent, child in HIERARCHY_EDGES:
        logits = logits.at[:, ls[child]].add(logits[:, ls[parent]])
    return logits


if __name__ == "__main__":
    key = jax.random.PRNGKey(0)
    k_x, k_model = jax.random.split(key)

    B, C, H, W = 2, 4, 16, 16
    x = jax.random.normal(k_x, (B, C, H, W), jnp.float32)  # NCHW, like PyTorch

    model = HierarchyWrapperPallas(C, H, W, k_model)
    out = jax.block_until_ready(model(x))
    assert out.shape == (B, NUM_TASKS)

    # 1) Exact check vs an XLA emulation of the same folded bf16 parameters
    #    (bf16 activations, bf16 transposed weights, f32 accumulate + bias).
    x_flat = x.reshape(B, -1)
    ref_exact = (jax.lax.dot_general(
        x_flat.astype(jnp.bfloat16), model.w_t[:NUM_TASKS, :model.d],
        dimension_numbers=(((1,), (1,)), ((), ())),
        preferred_element_type=jnp.float32) + model.b_p[:, :NUM_TASKS])
    err = jnp.max(jnp.abs(out - ref_exact))
    assert jnp.allclose(out, ref_exact, atol=1e-3, rtol=1e-3), f"exact err {err}"

    # 2) Semantic check vs the PyTorch-style sequential hierarchy adds on the
    #    un-quantized f32 model (tolerance covers the bf16 weight/act cast).
    ref_sem = _reference_semantic(x, model.w_base, model.b_base)
    err = jnp.max(jnp.abs(out - ref_sem))
    assert jnp.allclose(out, ref_sem, atol=5e-2, rtol=5e-2), f"semantic err {err}"

    # 3) Exercise the multi-step K accumulation path with a forced small tile
    #    (4 K-steps over D=1024).
    model_mk = HierarchyWrapperPallas(C, H, W, k_model, max_tk=256)
    assert model_mk.num_k == 4 and model_mk.tk == 256
    out_mk = jax.block_until_ready(model_mk(x))
    err = jnp.max(jnp.abs(out_mk - out))
    assert jnp.allclose(out_mk, out, atol=1e-3, rtol=1e-3), f"K-tiling err {err}"

    print("KERNEL_OK")
</pallas_src>

<mosaic_0001>
module attributes {stable_mosaic.version = 11 : i64} {
  func.func @_linear_hier_kernel(%arg0: i32, %arg1: i32, %arg2: memref<8x1024xbf16, #tpu.memory_space<vmem>>, %arg3: memref<16x1024xbf16, #tpu.memory_space<vmem>>, %arg4: memref<1x16xf32, #tpu.memory_space<vmem>>, %arg5: memref<8x16xf32, #tpu.memory_space<vmem>>, %arg6: memref<8x16xf32, #tpu.memory_space<vmem>>) attributes {dimension_semantics = [#tpu.dimension_semantics<parallel>, #tpu.dimension_semantics<arbitrary>], iteration_bounds = array<i64: 1, 1>, scalar_prefetch = 0 : i64, scratch_operands = 1 : i64, tpu.core_type = #tpu.core_type<tc>, window_params = [{transform_indices = @transform_0, window_bounds = array<i64: 8, 1024>}, {transform_indices = @transform_1, window_bounds = array<i64: 16, 1024>}, {pipeline_mode = #tpu.pipeline_mode<synchronous>, transform_indices = @transform_2, window_bounds = array<i64: 1, 16>}, {transform_indices = @transform_3, window_bounds = array<i64: 8, 16>}]} {
    %c0_i32 = arith.constant 0 : i32
    %0 = arith.cmpi eq, %arg1, %c0_i32 : i32
    %1 = arith.extui %0 : i1 to i32
    %c0_i32_0 = arith.constant 0 : i32
    %2 = arith.cmpi ne, %1, %c0_i32_0 : i32
    scf.if %2 {
      %c0_10 = arith.constant 0 : index
      %c0_11 = arith.constant 0 : index
      %12 = vector.load %arg4[%c0_10, %c0_11] : memref<1x16xf32, #tpu.memory_space<vmem>>, vector<1x16xf32>
      %13 = vector.shape_cast %12 : vector<1x16xf32> to vector<1x16xf32>
      %14 = vector.broadcast %13 : vector<1x16xf32> to vector<8x16xf32>
      %c0_12 = arith.constant 0 : index
      %c0_13 = arith.constant 0 : index
      %15 = vector.load %arg6[%c0_12, %c0_13] : memref<8x16xf32, #tpu.memory_space<vmem>>, vector<8x16xf32>
      tpu.vector_store %arg6[%c0_12, %c0_13], %14 {strides = array<i32>} : memref<8x16xf32, #tpu.memory_space<vmem>>, vector<8x16xf32>,
    } else {
    }
    %c0 = arith.constant 0 : index
    %c0_1 = arith.constant 0 : index
    %3 = vector.load %arg6[%c0, %c0_1] : memref<8x16xf32, #tpu.memory_space<vmem>>, vector<8x16xf32>
    %c0_2 = arith.constant 0 : index
    %c0_3 = arith.constant 0 : index
    %4 = vector.load %arg2[%c0_2, %c0_3] : memref<8x1024xbf16, #tpu.memory_space<vmem>>, vector<8x1024xbf16>
    %c0_4 = arith.constant 0 : index
    %c0_5 = arith.constant 0 : index
    %5 = vector.load %arg3[%c0_4, %c0_5] : memref<16x1024xbf16, #tpu.memory_space<vmem>>, vector<16x1024xbf16>
    %cst = arith.constant dense<0.000000e+00> : vector<8x16xf32>
    %6 = tpu.matmul %4, %5, %cst {dimension_numbers = #tpu.dot_dimension_numbers<[1], [1], [0], [0], [0, 0, 1, 0], [], []>} : vector<8x1024xbf16>, vector<16x1024xbf16>, vector<8x16xf32> -> vector<8x16xf32>
    %7 = arith.addf %3, %6 : vector<8x16xf32>
    %c0_6 = arith.constant 0 : index
    %c0_7 = arith.constant 0 : index
    %8 = vector.load %arg6[%c0_6, %c0_7] : memref<8x16xf32, #tpu.memory_space<vmem>>, vector<8x16xf32>
    tpu.vector_store %arg6[%c0_6, %c0_7], %7 {strides = array<i32>} : memref<8x16xf32, #tpu.memory_space<vmem>>, vector<8x16xf32>,
    %c0_i32_8 = arith.constant 0 : i32
    %9 = arith.cmpi eq, %arg1, %c0_i32_8 : i32
    %10 = arith.extui %9 : i1 to i32
    %c0_i32_9 = arith.constant 0 : i32
    %11 = arith.cmpi ne, %10, %c0_i32_9 : i32
    scf.if %11 {
      %c0_10 = arith.constant 0 : index
      %c0_11 = arith.constant 0 : index
      %12 = vector.load %arg6[%c0_10, %c0_11] : memref<8x16xf32, #tpu.memory_space<vmem>>, vector<8x16xf32>
      %c0_12 = arith.constant 0 : index
      %c0_13 = arith.constant 0 : index
      %13 = vector.load %arg5[%c0_12, %c0_13] : memref<8x16xf32, #tpu.memory_space<vmem>>, vector<8x16xf32>
      tpu.vector_store %arg5[%c0_12, %c0_13], %12 {strides = array<i32>} : memref<8x16xf32, #tpu.memory_space<vmem>>, vector<8x16xf32>,
    } else {
    }
    return
  }
  func.func @transform_0(%arg0: i32, %arg1: i32) -> (i32, i32) {
    %c0_i32 = arith.constant 0 : i32
    return %arg0, %arg1 : i32, i32
  }
  func.func @transform_1(%arg0: i32, %arg1: i32) -> (i32, i32) {
    %c0_i32 = arith.constant 0 : i32
    %c0_i32_0 = arith.constant 0 : i32
    return %c0_i32, %arg1 : i32, i32
  }
  func.func @transform_2(%arg0: i32, %arg1: i32) -> (i32, i32) {
    %c0_i32 = arith.constant 0 : i32
    %c0_i32_0 = arith.constant 0 : i32
    %c0_i32_1 = arith.constant 0 : i32
    return %c0_i32, %c0_i32_0 : i32, i32
  }
  func.func @transform_3(%arg0: i32, %arg1: i32) -> (i32, i32) {
    %c0_i32 = arith.constant 0 : i32
    %c0_i32_0 = arith.constant 0 : i32
    return %arg0, %c0_i32 : i32, i32
  }
}

</mosaic_0001>

<bundles_post_ra>
// kernel: _run_kernel.1
= control target key start
LH: loop header
LB: loop body
LE: loop exit
PB: predicated region body
PF: predicated region fallthrough
CT: control target
= control target key end

     0   :  { %8 = vsyncpa [#allocation4], 0  ;;  %s496_s0 = inlined_call_operand.hbm [shape: bf16[8,1024], index: 0, kind: input, shape index: {}]   ;;  %s497_s1 = inlined_call_operand.hbm [shape: bf16[16,1024], index: 1, kind: input, shape index: {}]   ;;  %s498_s2 = inlined_call_operand.vmem [shape: f32[1,16], index: 2, kind: input, shape index: {}]   ;;  %s499_s3 = inlined_call_operand.hbm [shape: f32[8,16], index: 3, kind: output, shape index: {}]  }
   0x1   :  { %9 = vsyncpa [#allocation7], 0 }
   0x2   :  { %10 = vsyncpa [#allocation5], 0  ;;  %s422_s12 = smov [#allocation3]   ;;  %s423_s14 = smov [#allocation6]  }
   0x3   :  { %s17_s13 = sshll.u32 %s422_s12, 4  ;;  %s26_s15 = sshll.u32 %s423_s14, 4  ;;  %s18_s13 = int_to_ptr.vmem [resolvable:$true] %s17_s13  ;;  %s447_s15 = int_to_ptr.vmem [resolvable:$true] %s26_s15 }
   0x4   :  { %s350_s18 = scalar_lea.hbm %s496_s0, 512 }
   0x5   :  { %p351_p0 = scmp.ne.s32.totalorder %s496_s0, %s350_s18  ;;  %p354_p1 = scmp.lt.u32.totalorder %s350_s18, %s496_s0 }
   0x7   :  { %p356_p2 = pnand %p354_p1, %p351_p0 }
   0x9   :  { %359 = shalt.err (!%p356_p2)
}
   0xa   :  { %s360_s23 = scalar_lea.vmem %s18_s13, 512  ;;  %p365_p4 = scmp.lt.s32.totalorder %s18_s13, %s18_s13 }
   0xb   :  { %p361_p3 = scmp.ne.s32.totalorder %s18_s13, %s360_s23  ;;  %p366_p5 = scmp.lt.s32.totalorder %s360_s23, %s360_s23 }
   0xd   :  { %p367_p6 = por %p366_p5, %p365_p4 }
   0xf   :  { %p368_p7 = pnand %p367_p6, %p361_p3 }
  0x11   :  { %371 = shalt.err (!%p368_p7)
}
  0x12   :  { %20 = dma.hbm_to_vmem [thread:$0]  %s496_s0, 512, %s18_s13, [#allocation4]  }
  0x13   :  { %s372_s28 = scalar_lea.hbm %s497_s1, 1024 }
  0x14   :  { %p373_p8 = scmp.ne.s32.totalorder %s497_s1, %s372_s28  ;;  %p376_p9 = scmp.lt.u32.totalorder %s372_s28, %s497_s1 }
  0x16   :  { %p378_p10 = pnand %p376_p9, %p373_p8 }
  0x18   :  { %381 = shalt.err (!%p378_p10)
}
  0x19   :  { %s382_s6 = scalar_lea.vmem %s447_s15, 1024  ;;  %p387_p12 = scmp.lt.s32.totalorder %s447_s15, %s447_s15 }
  0x1a   :  { %p383_p11 = scmp.ne.s32.totalorder %s447_s15, %s382_s6  ;;  %p388_p13 = scmp.lt.s32.totalorder %s382_s6, %s382_s6 }
  0x1c   :  { %p389_p0 = por %p388_p13, %p387_p12 }
  0x1e   :  { %p390_p1 = pnand %p389_p0, %p383_p11 }
  0x20   :  { %393 = shalt.err (!%p390_p1)
}
  0x21   :  { %s424_s0 = smov 512   ;;  %s425_s7 = smov 32  }
  0x22   :  { %32 = dma.hbm_to_vmem [thread:$0]  %s497_s1, 1024, %s447_s15, [#allocation7], %s424_s0, %s424_s0, %s425_s7  }
  0x23   :  { %416 = dma.done.wait [#allocation4], 512  }
  0x24   :  { %417 = vsyncadd [#allocation4], 4294966784 }
  0x25   :  { %418 = dma.done.wait [#allocation7], 1024  }
  0x26   :  { %419 = vsyncadd [#allocation7], 4294966272  ;;  %v60_v0 = vld [vmem:[#allocation6] sm:$0xff]  ;;  %v61_v2 = vld [vmem:[#allocation6 + $0x8] sm:$0xff]  ;;  %vm53_vm0 = vcmask 130048  }
  0x27   :  { %v64_v1 = vld [vmem:[#allocation6 + $0x20] sm:$0xff]  ;;  %v65_v4 = vld [vmem:[#allocation6 + $0x28] sm:$0xff]  ;;  %v62_v11 = vld [vmem:[#allocation6 + $0x10] sm:$0xff] }
  0x28   :  { %v330_v3 = vcombine.high %v60_v0, %v64_v1  ;;  %v329_v5 = vcombine.low %v60_v0, %v64_v1  ;;  %v56_v6 = vld [vmem:[#allocation3] sm:$0xff]  ;;  %v57_v7 = vld [vmem:[#allocation3 + $0x8] sm:$0xff]  ;;  %v332_v8 = vcombine.high %v61_v2, %v65_v4  ;;  %v331_v9 = vcombine.low %v61_v2, %v65_v4  ;;  %v66_v12 = vld [vmem:[#allocation6 + $0x30] sm:$0xff] }
  0x29   :  { %v322_v10 = vcombine.high %v56_v6, %v56_v6  ;;  %v63_v13 = vld [vmem:[#allocation6 + $0x18] sm:$0xff]  ;;  %v324_v14 = vcombine.high %v57_v7, %v57_v7  ;;  %v334_v15 = vcombine.high %v62_v11, %v66_v12  ;;  %v58_v18 = vld [vmem:[#allocation3 + $0x10] sm:$0xff]  ;;  %v321_v19 = vcombine.low %v56_v6, %v56_v6 }
  0x2a   :  { %136 = vmatprep.subr.bf16.mxu0 %v330_v3  ;;  %v67_v16 = vld [vmem:[#allocation6 + $0x38] sm:$0xff]  ;;  %176 = vmatprep.subr.bf16.mxu1 %v332_v8  ;;  %v323_v21 = vcombine.low %v57_v7, %v57_v7  ;;  %v333_v22 = vcombine.low %v62_v11, %v66_v12  ;;  %v326_v24 = vcombine.high %v58_v18, %v58_v18 }
  0x2b   :  { %137 = vmatpush1.bf16.xpose.msra.mxu0 %v329_v5  ;;  %v336_v17 = vcombine.high %v63_v13, %v67_v16  ;;  %177 = vmatpush1.bf16.xpose.msra.mxu1 %v331_v9  ;;  %v59_v20 = vld [vmem:[#allocation3 + $0x18] sm:$0xff]  ;;  %v335_v23 = vcombine.low %v63_v13, %v67_v16  ;;  %v325_v26 = vcombine.low %v58_v18, %v58_v18 }
  0x2c   :  { %168 = vmatprep.mubr.bf16.mxu0 %v322_v10  ;;  %208 = vmatprep.mubr.bf16.mxu1 %v324_v14  ;;  %v328_v25 = vcombine.high %v59_v20, %v59_v20  ;;  %v327_v27 = vcombine.low %v59_v20, %v59_v20  ;;  %v320_v28 = vld [vmem:[%s498_s2] ss:$0 sm:$0xff]  ;;  %s426_s2 = smov [#allocation8]  }
  0x2d   :  { %216 = vmatprep.subr.bf16.mxu0 %v334_v15  ;;  %256 = vmatprep.subr.bf16.mxu1 %v336_v17  ;;  %54 = vst.msk [vmem:[#allocation2] sm:$0xff] %vm53_vm0, %v320_v28  ;;  %s310_s11 = sshll.u32 %s426_s2, 4  ;;  %s311_s11 = int_to_ptr.vmem [resolvable:$true] %s310_s11 }
  0x2e   :  { %s394_s12 = scalar_lea.vmem %s311_s11, 128  ;;  %p399_p3 = scmp.lt.s32.totalorder %s311_s11, %s311_s11 }
  0x2f   :  { %p395_p2 = scmp.ne.s32.totalorder %s311_s11, %s394_s12  ;;  %p400_p4 = scmp.lt.s32.totalorder %s394_s12, %s394_s12 }
  0x31   :  { %p401_p5 = por %p400_p4, %p399_p3 }
  0x32   :  { %169 = vmatmul.mubr.bf16.vlgmr.msra.gmra.mrb[0].mxu0 %v321_v19  ;;  %209 = vmatmul.mubr.bf16.vlgmr.msra.gmra.mrb[0].mxu1 %v323_v21 }
  0x33   :  { %217 = vmatpush1.bf16.xpose.msra.mxu0 %v333_v22  ;;  %257 = vmatpush1.bf16.xpose.msra.mxu1 %v335_v23  ;;  %p402_p6 = pnand %p401_p5, %p395_p2 }
  0x34   :  { %248 = vmatprep.mubr.bf16.mxu0 %v326_v24  ;;  %288 = vmatprep.mubr.bf16.mxu1 %v328_v25  ;;  %v55_v42 = vld [vmem:[#allocation2] sm:$0xff] }
  0x3a   :  { %249 = vmatmul.mubr.bf16.vlgmr.msra.gmra.mrb[4].mxu0 %v325_v26  ;;  %289 = vmatmul.mubr.bf16.vlgmr.msra.gmra.mrb[4].mxu1 %v327_v27 }
 0x105   :  { %v170_v29 = vpop.f32.mrb[0].mxu0  ;;  %v210_v30 = vpop.f32.mrb[0].mxu1 }
 0x106   :  { %v172_v31 = vpop.f32.mrb[1].mxu0  ;;  %v211_v32 = vadd.f32 %v210_v30, %v170_v29  ;;  %v212_v33 = vpop.f32.mrb[1].mxu1 }
 0x107   :  { %v173_v34 = vpop.f32.mrb[2].mxu0  ;;  %v213_v35 = vpop.f32.mrb[2].mxu1 }
 0x108   :  { %v174_v36 = vpop.f32.mrb[3].mxu0  ;;  %v214_v37 = vpop.f32.mrb[3].mxu1 }
 0x10d   :  { %v250_v38 = vpop.f32.mrb[4].mxu0  ;;  %v290_v40 = vpop.f32.mrb[4].mxu1 }
 0x10e   :  { %v251_v39 = vadd.f32 %v250_v38, %v211_v32  ;;  %v252_v41 = vpop.f32.mrb[5].mxu0  ;;  %v292_v43 = vpop.f32.mrb[5].mxu1 }
 0x10f   :  { %v253_v44 = vpop.f32.mrb[6].mxu0  ;;  %v293_v46 = vpop.f32.mrb[6].mxu1 }
 0x110   :  { %v291_v45 = vadd.f32 %v290_v40, %v251_v39  ;;  %v254_v47 = vpop.f32.mrb[7].mxu0  ;;  %v294_v48 = vpop.f32.mrb[7].mxu1 }
 0x112   :  { %v296_v49 = vadd.f32 %v291_v45, %v55_v42 }
 0x114   :  { %298 = vst.msk [vmem:[#allocation2] sm:$0xff] %vm53_vm0, %v296_v49 }
 0x11b   :  { %v302_v50 = vld [vmem:[#allocation2] sm:$0xff] }
 0x11c   :  { %303 = vst.msk [vmem:[#allocation8] sm:$0xff] %vm53_vm0, %v302_v50 }
 0x11d   :  { %405 = shalt.err (!%p402_p6)
}
 0x11e   :  { %s406_s15 = scalar_lea.hbm %s499_s3, 128 }
 0x11f   :  { %p407_p7 = scmp.ne.s32.totalorder %s499_s3, %s406_s15  ;;  %p410_p8 = scmp.lt.u32.totalorder %s406_s15, %s499_s3 }
 0x121   :  { %p412_p9 = pnand %p410_p8, %p407_p7 }
 0x123   :  { %415 = shalt.err (!%p412_p9)
}
 0x124   :  { %313 = dma.vmem_to_hbm [thread:$0]  %s311_s11, 128, %s499_s3, [#allocation5]  }
 0x125   :  { %420 = dma.done.wait [#allocation5], 128  }
 0x126   :  { %421 = vsyncadd [#allocation5], 4294967168 }
 0x127   :  { %317 = vsyncpa [#allocation4], 1 }
 0x128   :  { %318 = vsyncpa [#allocation7], 1 }
 0x129   :  { %319 = vsyncpa [#allocation5], 1 }

</bundles_post_ra>
